<compile_context>
chip_gen: v7x
topology: tpu7x:2x2x1
jax: 0.10.0
libtpu: 0.0.40
codegen_flags: <defaults>
</compile_context>

<pallas_src>
import functools

import jax
import jax.numpy as jnp
import numpy as np
from jax.experimental import pallas as pl
from jax.experimental.pallas import tpu as pltpu

BN_EPS = 1e-5
VMEM_LIMIT_BYTES = 32 * 1024 * 1024   # safe on v5e/v6e (128 MiB phys) and v7x (64 MiB)
TILE_BUDGET_BYTES = 14 * 1024 * 1024  # ~2x headroom under VMEM_LIMIT_BYTES
MAX_TILE_M = 1024                     # diminishing returns past ~512-1024 rows


def _round_up(x, mult):
    return (x + mult - 1) // mult * mult


# ---------------------------------------------------------------------------
# Kernel 1: y = relu(x) @ W  (grouped 1x1 conv as block-diag matmul) and
#           per-channel partial sum / sum-of-squares for this grid split.
# Grid: (num_splits [parallel], steps_per_split [arbitrary]).
# ---------------------------------------------------------------------------
def _conv_stats_kernel(x_ref, w_ref, y_ref, sum_ref, sq_ref):
    i = pl.program_id(1)

    @pl.when(i == 0)
    def _():
        sum_ref[...] = jnp.zeros_like(sum_ref)
        sq_ref[...] = jnp.zeros_like(sq_ref)

    xr = jnp.maximum(x_ref[...], 0.0)                         # ReLU
    y = jnp.dot(xr, w_ref[...], preferred_element_type=jnp.float32)
    y_ref[...] = y

    c = y.shape[-1]
    sum_ref[...] += jnp.sum(y, axis=0, keepdims=True).reshape(1, 1, c)
    sq_ref[...] += jnp.sum(y * y, axis=0, keepdims=True).reshape(1, 1, c)


# ---------------------------------------------------------------------------
# Kernel 2: combine per-split partial statistics and batch-norm normalize.
# ---------------------------------------------------------------------------
def _bn_kernel(y_ref, sum_ref, sq_ref, o_ref, *, count):
    s = jnp.sum(sum_ref[...], axis=0)                # (1, c_lane)
    q = jnp.sum(sq_ref[...], axis=0)                 # (1, c_lane)
    mean = s / count
    var = jnp.maximum(q / count - mean * mean, 0.0)  # clamp: no rsqrt(neg) NaN
    inv = jax.lax.rsqrt(var + BN_EPS)
    o_ref[...] = (y_ref[...] - mean) * inv


def _pick_tile_m(m, c_in, c_lane):
    """Largest multiple-of-8 row tile that fits a double-buffered VMEM budget."""
    bytes_per_row = 2 * 4 * (c_in + c_lane)            # x + y tiles, 2 buffers, f32
    fixed = 2 * 4 * c_in * c_lane + 8 * 4 * c_lane     # weight + stat buffers
    tile = (TILE_BUDGET_BYTES - fixed) // bytes_per_row
    tile = max(8, min(int(tile) // 8 * 8, MAX_TILE_M))
    return min(tile, _round_up(m, 8))


def group_dense_forward(x_nchw, w_blockdiag, c_out, *, interpret=False):
    """x_nchw: (N, C_in, H, W) f32; w_blockdiag: (C_in_pad, C_mid) f32."""
    n, c_in, h, w = x_nchw.shape
    c_in_pad, c_mid = w_blockdiag.shape

    # Final channel count of the module: pad up to C_out only if c_mid < C_out.
    c_final = max(c_mid, c_out)
    # Lane-dense channel width for all kernel outputs.
    c_lane = _round_up(c_final, 128)

    # Weight fed to the kernels:
    #  * rows beyond c_in correspond to zero-padded input channels -> dropped
    #    (relu(0) @ W == 0), so x is never padded in HBM.
    #  * columns zero-padded to c_lane -> padded channels come out of BN as
    #    exactly 0, which implements the module's output zero-pad for free.
    w_use = jnp.zeros((c_in, c_lane), dtype=jnp.float32)
    w_use = w_use.at[:, :c_mid].set(w_blockdiag[:c_in, :])

    # NCHW -> channels-last 2-D slab (M, C_in).
    x2d = jnp.transpose(x_nchw, (0, 2, 3, 1)).reshape(n * h * w, c_in)
    m = n * h * w

    tile_m = _pick_tile_m(m, c_in, c_lane)
    total_tiles = pl.cdiv(m, tile_m)
    num_splits = 2 if total_tiles >= 2 else 1   # feeds both v7x TensorCores
    steps = pl.cdiv(total_tiles, num_splits)
    m_pad = steps * num_splits * tile_m
    if m_pad > m:
        # Zero rows: relu(0) @ W == 0, contributes nothing to sum/sumsq.
        x2d = jnp.pad(x2d, ((0, m_pad - m), (0, 0)))

    # ---- pass 1: grouped 1x1 conv (+ ReLU) and per-split partial statistics ----
    y, sums, sqs = pl.pallas_call(
        _conv_stats_kernel,
        out_shape=(
            jax.ShapeDtypeStruct((m_pad, c_lane), jnp.float32),
            jax.ShapeDtypeStruct((num_splits, 1, c_lane), jnp.float32),
            jax.ShapeDtypeStruct((num_splits, 1, c_lane), jnp.float32),
        ),
        grid_spec=pltpu.PrefetchScalarGridSpec(
            num_scalar_prefetch=0,
            grid=(num_splits, steps),
            in_specs=[
                pl.BlockSpec((tile_m, c_in), lambda s, i: (s * steps + i, 0)),
                pl.BlockSpec((c_in, c_lane), lambda s, i: (0, 0)),
            ],
            out_specs=[
                pl.BlockSpec((tile_m, c_lane), lambda s, i: (s * steps + i, 0)),
                pl.BlockSpec((1, 1, c_lane), lambda s, i: (s, 0, 0)),
                pl.BlockSpec((1, 1, c_lane), lambda s, i: (s, 0, 0)),
            ],
        ),
        compiler_params=pltpu.CompilerParams(
            dimension_semantics=("parallel", "arbitrary"),
            vmem_limit_bytes=VMEM_LIMIT_BYTES),
        interpret=interpret,
    )(x2d, w_use)

    # ---- pass 2: combine partial statistics + batch-norm normalization ----
    y_bn = pl.pallas_call(
        functools.partial(_bn_kernel, count=float(m)),
        out_shape=jax.ShapeDtypeStruct((m_pad, c_lane), jnp.float32),
        grid_spec=pltpu.PrefetchScalarGridSpec(
            num_scalar_prefetch=0,
            grid=(m_pad // tile_m,),
            in_specs=[
                pl.BlockSpec((tile_m, c_lane), lambda i: (i, 0)),
                pl.BlockSpec((num_splits, 1, c_lane), lambda i: (0, 0, 0)),
                pl.BlockSpec((num_splits, 1, c_lane), lambda i: (0, 0, 0)),
            ],
            out_specs=pl.BlockSpec((tile_m, c_lane), lambda i: (i, 0)),
        ),
        compiler_params=pltpu.CompilerParams(
            dimension_semantics=("parallel",),
            vmem_limit_bytes=VMEM_LIMIT_BYTES),
        interpret=interpret,
    )(y, sums, sqs)

    # Columns c_mid..c_final are exactly 0 after BN (zero weight columns), which
    # is the module's F.pad to C_out; slice away lane/row padding, back to NCHW.
    out = y_bn[:m, :c_final].reshape(n, h, w, c_final)
    return jnp.transpose(out, (0, 3, 1, 2))


def make_group_dense_params(c_in, complexity, key):
    """Replicates GroupDENSE.__init__ shape logic; returns block-diag weight."""
    two_c = 2 * complexity
    c_in_pad = c_in
    if c_in > (c_in // two_c) * two_c:
        c_in_pad = (c_in // two_c + 1) * two_c
    c_mid = c_in_pad // 2
    groups = c_mid // complexity
    in_per_g = c_in_pad // groups      # == 2*complexity
    out_per_g = c_mid // groups        # == complexity

    # deterministic synthetic conv weight, PyTorch layout (C_mid, in_per_g, 1, 1)
    w_conv = jax.random.normal(key, (c_mid, in_per_g), dtype=jnp.float32) * 0.1

    # build block-diagonal (C_in_pad, C_mid) matrix for x @ W
    w_bd = jnp.zeros((c_in_pad, c_mid), dtype=jnp.float32)
    for g in range(groups):
        blk = w_conv[g * out_per_g:(g + 1) * out_per_g, :]   # (out_per_g, in_per_g)
        w_bd = w_bd.at[g * in_per_g:(g + 1) * in_per_g,
                       g * out_per_g:(g + 1) * out_per_g].set(blk.T)
    return w_bd, c_in_pad, c_mid


def reference_forward(x_nchw, w_bd, c_out):
    """Pure-JAX reference of the same forward (training-mode BN)."""
    n, c_in, h, w = x_nchw.shape
    c_in_pad, c_mid = w_bd.shape
    if c_in_pad > c_in:
        x_nchw = jnp.pad(x_nchw, ((0, 0), (0, c_in_pad - c_in), (0, 0), (0, 0)))
    x2d = jnp.transpose(x_nchw, (0, 2, 3, 1)).reshape(-1, c_in_pad)
    y = jnp.maximum(x2d, 0.0) @ w_bd
    mean = y.mean(axis=0)
    var = y.var(axis=0)                       # biased
    y = (y - mean) / jnp.sqrt(var + BN_EPS)
    if c_mid < c_out:
        y = jnp.pad(y, ((0, 0), (0, c_out - c_mid)))
    return jnp.transpose(y.reshape(n, h, w, -1), (0, 3, 1, 2))


if __name__ == "__main__":
    # Small shapes: C_in=6 with complexity=2 forces the input-channel padding
    # branch (6 -> 8), C_out=10 forces the output-channel padding branch (4 -> 10).
    N, C_IN, H, W = 2, 6, 8, 8
    COMPLEXITY = 2
    C_OUT = 10

    key = jax.random.PRNGKey(0)
    kx, kw = jax.random.split(key)
    x = jax.random.normal(kx, (N, C_IN, H, W), dtype=jnp.float32)

    w_bd, c_in_pad, c_mid = make_group_dense_params(C_IN, COMPLEXITY, kw)

    out = group_dense_forward(x, w_bd, C_OUT)
    out = jax.block_until_ready(out)

    ref = reference_forward(x, w_bd, C_OUT)
    np.testing.assert_allclose(np.asarray(out), np.asarray(ref),
                               rtol=1e-4, atol=1e-4)
    assert out.shape == (N, C_OUT, H, W)

    print("KERNEL_OK")
</pallas_src>

<mosaic_0001>
module attributes {stable_mosaic.version = 11 : i64} {
  func.func @_conv_stats_kernel(%arg0: i32, %arg1: i32, %arg2: memref<128x6xf32, #tpu.memory_space<vmem>>, %arg3: memref<6x128xf32, #tpu.memory_space<vmem>>, %arg4: memref<128x128xf32, #tpu.memory_space<vmem>>, %arg5: memref<1x1x128xf32, #tpu.memory_space<vmem>>, %arg6: memref<1x1x128xf32, #tpu.memory_space<vmem>>) attributes {dimension_semantics = [#tpu.dimension_semantics<parallel>, #tpu.dimension_semantics<arbitrary>], iteration_bounds = array<i64: 1, 1>, scalar_prefetch = 0 : i64, scratch_operands = 0 : i64, tpu.core_type = #tpu.core_type<tc>, window_params = [{transform_indices = @transform_0, window_bounds = array<i64: 128, 6>}, {pipeline_mode = #tpu.pipeline_mode<synchronous>, transform_indices = @transform_1, window_bounds = array<i64: 6, 128>}, {transform_indices = @transform_2, window_bounds = array<i64: 128, 128>}, {transform_indices = @transform_3, window_bounds = array<i64: 1, 1, 128>}, {transform_indices = @transform_4, window_bounds = array<i64: 1, 1, 128>}]} {
    %c0_i32 = arith.constant 0 : i32
    %0 = arith.cmpi eq, %arg1, %c0_i32 : i32
    %1 = arith.extui %0 : i1 to i32
    %c0_i32_0 = arith.constant 0 : i32
    %2 = arith.cmpi ne, %1, %c0_i32_0 : i32
    scf.if %2 {
      %cst_21 = arith.constant 0.000000e+00 : f32
      %22 = vector.broadcast %cst_21 : f32 to vector<1x1x128xf32>
      %c0_22 = arith.constant 0 : index
      %c0_23 = arith.constant 0 : index
      %c0_24 = arith.constant 0 : index
      %23 = vector.load %arg5[%c0_22, %c0_23, %c0_24] : memref<1x1x128xf32, #tpu.memory_space<vmem>>, vector<1x1x128xf32>
      tpu.vector_store %arg5[%c0_22, %c0_23, %c0_24], %22 {strides = array<i32>} : memref<1x1x128xf32, #tpu.memory_space<vmem>>, vector<1x1x128xf32>,
      %cst_25 = arith.constant 0.000000e+00 : f32
      %24 = vector.broadcast %cst_25 : f32 to vector<1x1x128xf32>
      %c0_26 = arith.constant 0 : index
      %c0_27 = arith.constant 0 : index
      %c0_28 = arith.constant 0 : index
      %25 = vector.load %arg6[%c0_26, %c0_27, %c0_28] : memref<1x1x128xf32, #tpu.memory_space<vmem>>, vector<1x1x128xf32>
      tpu.vector_store %arg6[%c0_26, %c0_27, %c0_28], %24 {strides = array<i32>} : memref<1x1x128xf32, #tpu.memory_space<vmem>>, vector<1x1x128xf32>,
    } else {
    }
    %c0 = arith.constant 0 : index
    %c0_1 = arith.constant 0 : index
    %3 = vector.load %arg2[%c0, %c0_1] : memref<128x6xf32, #tpu.memory_space<vmem>>, vector<128x6xf32>
    %cst = arith.constant 0.000000e+00 : f32
    %4 = vector.broadcast %cst : f32 to vector<128x6xf32>
    %5 = arith.maximumf %3, %4 : vector<128x6xf32>
    %c0_2 = arith.constant 0 : index
    %c0_3 = arith.constant 0 : index
    %6 = vector.load %arg3[%c0_2, %c0_3] : memref<6x128xf32, #tpu.memory_space<vmem>>, vector<6x128xf32>
    %cst_4 = arith.constant dense<0.000000e+00> : vector<128x128xf32>
    %7 = tpu.matmul %5, %6, %cst_4 {dimension_numbers = #tpu.dot_dimension_numbers<[1], [0], [0], [1], [0, 0, 1, 1], [], []>} : vector<128x6xf32>, vector<6x128xf32>, vector<128x128xf32> -> vector<128x128xf32>
    %c0_5 = arith.constant 0 : index
    %c0_6 = arith.constant 0 : index
    %8 = vector.load %arg4[%c0_5, %c0_6] : memref<128x128xf32, #tpu.memory_space<vmem>>, vector<128x128xf32>
    tpu.vector_store %arg4[%c0_5, %c0_6], %7 {strides = array<i32>} : memref<128x128xf32, #tpu.memory_space<vmem>>, vector<128x128xf32>,
    %c0_7 = arith.constant 0 : index
    %c0_8 = arith.constant 0 : index
    %c0_9 = arith.constant 0 : index
    %9 = vector.load %arg5[%c0_7, %c0_8, %c0_9] : memref<1x1x128xf32, #tpu.memory_space<vmem>>, vector<1x1x128xf32>
    %cst_10 = arith.constant dense<0.000000e+00> : vector<128xf32>
    %10 = vector.multi_reduction <add>, %7, %cst_10 [0] : vector<128x128xf32> to vector<128xf32>
    %11 = vector.shape_cast %10 : vector<128xf32> to vector<1x128xf32>
    %12 = vector.shape_cast %11 : vector<1x128xf32> to vector<1x1x128xf32>
    %13 = arith.addf %9, %12 : vector<1x1x128xf32>
    %c0_11 = arith.constant 0 : index
    %c0_12 = arith.constant 0 : index
    %c0_13 = arith.constant 0 : index
    %14 = vector.load %arg5[%c0_11, %c0_12, %c0_13] : memref<1x1x128xf32, #tpu.memory_space<vmem>>, vector<1x1x128xf32>
    tpu.vector_store %arg5[%c0_11, %c0_12, %c0_13], %13 {strides = array<i32>} : memref<1x1x128xf32, #tpu.memory_space<vmem>>, vector<1x1x128xf32>,
    %c0_14 = arith.constant 0 : index
    %c0_15 = arith.constant 0 : index
    %c0_16 = arith.constant 0 : index
    %15 = vector.load %arg6[%c0_14, %c0_15, %c0_16] : memref<1x1x128xf32, #tpu.memory_space<vmem>>, vector<1x1x128xf32>
    %16 = arith.mulf %7, %7 : vector<128x128xf32>
    %cst_17 = arith.constant dense<0.000000e+00> : vector<128xf32>
    %17 = vector.multi_reduction <add>, %16, %cst_17 [0] : vector<128x128xf32> to vector<128xf32>
    %18 = vector.shape_cast %17 : vector<128xf32> to vector<1x128xf32>
    %19 = vector.shape_cast %18 : vector<1x128xf32> to vector<1x1x128xf32>
    %20 = arith.addf %15, %19 : vector<1x1x128xf32>
    %c0_18 = arith.constant 0 : index
    %c0_19 = arith.constant 0 : index
    %c0_20 = arith.constant 0 : index
    %21 = vector.load %arg6[%c0_18, %c0_19, %c0_20] : memref<1x1x128xf32, #tpu.memory_space<vmem>>, vector<1x1x128xf32>
    tpu.vector_store %arg6[%c0_18, %c0_19, %c0_20], %20 {strides = array<i32>} : memref<1x1x128xf32, #tpu.memory_space<vmem>>, vector<1x1x128xf32>,
    return
  }
  func.func @transform_0(%arg0: i32, %arg1: i32) -> (i32, i32) {
    %c1_i32 = arith.constant 1 : i32
    %0 = arith.muli %arg0, %c1_i32 : i32
    %1 = arith.addi %0, %arg1 : i32
    %c0_i32 = arith.constant 0 : i32
    %c0_i32_0 = arith.constant 0 : i32
    return %1, %c0_i32 : i32, i32
  }
  func.func @transform_1(%arg0: i32, %arg1: i32) -> (i32, i32) {
    %c0_i32 = arith.constant 0 : i32
    %c0_i32_0 = arith.constant 0 : i32
    %c0_i32_1 = arith.constant 0 : i32
    return %c0_i32, %c0_i32_0 : i32, i32
  }
  func.func @transform_2(%arg0: i32, %arg1: i32) -> (i32, i32) {
    %c1_i32 = arith.constant 1 : i32
    %0 = arith.muli %arg0, %c1_i32 : i32
    %1 = arith.addi %0, %arg1 : i32
    %c0_i32 = arith.constant 0 : i32
    %c0_i32_0 = arith.constant 0 : i32
    return %1, %c0_i32 : i32, i32
  }
  func.func @transform_3(%arg0: i32, %arg1: i32) -> (i32, i32, i32) {
    %c0_i32 = arith.constant 0 : i32
    %c0_i32_0 = arith.constant 0 : i32
    %c0_i32_1 = arith.constant 0 : i32
    return %arg0, %c0_i32, %c0_i32_0 : i32, i32, i32
  }
  func.func @transform_4(%arg0: i32, %arg1: i32) -> (i32, i32, i32) {
    %c0_i32 = arith.constant 0 : i32
    %c0_i32_0 = arith.constant 0 : i32
    %c0_i32_1 = arith.constant 0 : i32
    return %arg0, %c0_i32, %c0_i32_0 : i32, i32, i32
  }
}

</mosaic_0001>

<bundles_post_ra>
// kernel: tpu_custom_call.1
= control target key start
LH: loop header
LB: loop body
LE: loop exit
PB: predicated region body
PF: predicated region fallthrough
CT: control target
= control target key end

     0   :  { %10 = vsyncpa [#allocation3], 0  ;;  %vm128_vm0 = vcmask 1045504   ;;  %vm79_vm1 = vcmask 48128   ;;  %s702_s0 = inlined_call_operand.vmem [shape: f32[128,6], index: 0, kind: input, shape index: {}]   ;;  %s703_s1 = inlined_call_operand.vmem [shape: f32[6,128], index: 1, kind: input, shape index: {}]   ;;  %s704_s2 = inlined_call_operand.hbm [shape: f32[128,128], index: 2, kind: output, shape index: {0}]   ;;  %s705_s3 = inlined_call_operand.hbm [shape: f32[1,1,128], index: 3, kind: output, shape index: {1}]   ;;  %s706_s4 = inlined_call_operand.hbm [shape: f32[1,1,128], index: 4, kind: output, shape index: {2}]  }
   0x1   :  { %v78_v0 = vld [vmem:[%s703_s1] sm:$0x3f]  ;;  %v47_v2 = vld [vmem:[%s702_s0 + $0x8] sm:$0xff]  ;;  %v48_v5 = vld [vmem:[%s702_s0 + $0x10] sm:$0xff] }
   0x2   :  { %v46_v1 = vld [vmem:[%s702_s0] sm:$0xff]  ;;  %444 = vmatprep.subr.msk.mxu0 %vm128_vm0, %v78_v0  ;;  %v63_v4 = vmax.f32 %v47_v2, 0.0  ;;  %v49_v6 = vld [vmem:[%s702_s0 + $0x18] sm:$0xff]  ;;  %470 = vmatprep.subr.msk.mxu1 %vm128_vm0, %v78_v0  ;;  %v64_v7 = vmax.f32 %v48_v5, 0.0  ;;  %v55_v10 = vld [vmem:[%s702_s0 + $0x48] sm:$0xff] }
   0x3   :  { %v62_v3 = vmax.f32 %v46_v1, 0.0  ;;  %445 = vmatpush3.msk.msra.mxu0 %vm128_vm0, %v78_v0  ;;  %v50_v8 = vld [vmem:[%s702_s0 + $0x20] sm:$0xff]  ;;  %471 = vmatpush3.msk.msra.mxu1 %vm128_vm0, %v78_v0  ;;  %v56_v11 = vld [vmem:[%s702_s0 + $0x50] sm:$0xff]  ;;  %v65_v12 = vmax.f32 %v49_v6, 0.0  ;;  %v71_v14 = vmax.f32 %v55_v10, 0.0  ;;  %v57_v16 = vld [vmem:[%s702_s0 + $0x58] sm:$0xff] }
   0x4   :  { %v54_v9 = vld [vmem:[%s702_s0 + $0x40] sm:$0xff]  ;;  %v72_v15 = vmax.f32 %v56_v11, 0.0  ;;  %v66_v17 = vmax.f32 %v50_v8, 0.0  ;;  %v51_v18 = vld [vmem:[%s702_s0 + $0x28] sm:$0xff]  ;;  %v52_v20 = vld [vmem:[%s702_s0 + $0x30] sm:$0xff] }
   0x5   :  { %446 = vmatprep.mubr.msk.f32.mxu0 %vm79_vm1, %v62_v3  ;;  %v70_v13 = vmax.f32 %v54_v9, 0.0  ;;  %v58_v19 = vld [vmem:[%s702_s0 + $0x60] sm:$0xff] }
   0x6   :  { %447 = vmatmul.mubr.msk.f32.vlgmr.msra.gmra.mrb[0].mxu0 %vm79_vm1, %v63_v4 }
   0x7   :  { %449 = vmatprep.mubr.msk.f32.mxu0 %vm79_vm1, %v64_v7  ;;  %458 = vmatprep.mubr.msk.f32.mxu1 %vm79_vm1, %v70_v13 }
   0x8   :  { %11 = vsyncpa [#allocation5], 0  ;;  %459 = vmatmul.mubr.msk.f32.vlgmr.msra.gmra.mrb[0].mxu1 %vm79_vm1, %v71_v14  ;;  %v73_v21 = vmax.f32 %v57_v16, 0.0  ;;  %v67_v22 = vmax.f32 %v51_v18, 0.0  ;;  %v74_v23 = vmax.f32 %v58_v19, 0.0  ;;  %v59_v24 = vld [vmem:[%s702_s0 + $0x68] sm:$0xff] }
   0x9   :  { %461 = vmatprep.mubr.msk.f32.mxu1 %vm79_vm1, %v72_v15  ;;  %v68_v25 = vmax.f32 %v52_v20, 0.0  ;;  %v53_v26 = vld [vmem:[%s702_s0 + $0x38] sm:$0xff]  ;;  %v60_v27 = vld [vmem:[%s702_s0 + $0x70] sm:$0xff]  ;;  %v75_v28 = vmax.f32 %v59_v24, 0.0  ;;  %v548_v33 = vmov 0.0  }
   0xa   :  { %450 = vmatmul.mubr.msk.f32.gmra.mrb[2].mxu0 %vm79_vm1, %v65_v12  ;;  %v69_v29 = vmax.f32 %v53_v26, 0.0  ;;  %v76_v30 = vmax.f32 %v60_v27, 0.0  ;;  %v61_v31 = vld [vmem:[%s702_s0 + $0x78] sm:$0xff]  ;;  %44 = vst [vmem:[#allocation4] sm:$0x1] %v548_v33  ;;  %s549_s0 = smov [#allocation2]  }
   0xb   :  { %452 = vmatprep.mubr.msk.f32.mxu0 %vm79_vm1, %v66_v17  ;;  %v77_v32 = vmax.f32 %v61_v31, 0.0  ;;  %45 = vst [vmem:[#allocation6] sm:$0x1] %v548_v33  ;;  %s366_s22 = sshll.u32 %s549_s0, 4  ;;  %s367_s22 = int_to_ptr.vmem [resolvable:$true] %s366_s22 }
   0xc   :  { %462 = vmatmul.mubr.msk.f32.gmra.mrb[2].mxu1 %vm79_vm1, %v73_v21  ;;  %s478_s23 = scalar_lea.vmem %s367_s22, 2048  ;;  %p483_p1 = scmp.lt.s32.totalorder %s367_s22, %s367_s22 }
   0xd   :  { %464 = vmatprep.mubr.msk.f32.mxu1 %vm79_vm1, %v74_v23  ;;  %p479_p0 = scmp.ne.s32.totalorder %s367_s22, %s478_s23  ;;  %p484_p2 = scmp.lt.s32.totalorder %s478_s23, %s478_s23 }
   0xe   :  { %453 = vmatmul.mubr.msk.f32.gmra.mrb[4].mxu0 %vm79_vm1, %v67_v22 }
   0xf   :  { %455 = vmatprep.mubr.msk.f32.mxu0 %vm79_vm1, %v68_v25  ;;  %p485_p3 = por %p484_p2, %p483_p1 }
  0x10   :  { %465 = vmatmul.mubr.msk.f32.gmra.mrb[4].mxu1 %vm79_vm1, %v75_v28 }
  0x11   :  { %467 = vmatprep.mubr.msk.f32.mxu1 %vm79_vm1, %v76_v30  ;;  %p486_p4 = pnand %p485_p3, %p479_p0 }
  0x12   :  { %456 = vmatmul.mubr.msk.f32.gmra.mrb[6].mxu0 %vm79_vm1, %v69_v29 }
  0x14   :  { %468 = vmatmul.mubr.msk.f32.gmra.mrb[6].mxu1 %vm79_vm1, %v77_v32 }
  0xd9   :  { %v448_v34 = vpop.f32.mrb[0].mxu0 }
  0xda   :  { %278 = vst [vmem:[#allocation2 + $0x8] sm:$0xff] %v448_v34  ;;  %v319_v35 = vmul.f32 %v448_v34, %v448_v34  ;;  %v198_v36 = vpop.f32.mrb[1].mxu0 }
  0xdb   :  { %277 = vst [vmem:[#allocation2] sm:$0xff] %v198_v36  ;;  %v294_v37 = vadd.f32 %v448_v34, %v198_v36  ;;  %v318_v38 = vmul.f32 %v198_v36, %v198_v36  ;;  %v646_v39 = vpop.f32.mrb[0].mxu1 }
  0xdc   :  { %286 = vst [vmem:[#allocation2 + $0x48] sm:$0xff] %v646_v39  ;;  %v238_v42 = vpop.f32.mrb[1].mxu1 }
  0xdd   :  { %v334_v40 = vadd.f32 %v319_v35, %v318_v38  ;;  %v451_v41 = vpop.f32.mrb[2].mxu0  ;;  %285 = vst [vmem:[#allocation2 + $0x40] sm:$0xff] %v238_v42  ;;  %v326_v6 = vmul.f32 %v238_v42, %v238_v42 }
  0xde   :  { %280 = vst [vmem:[#allocation2 + $0x18] sm:$0xff] %v451_v41  ;;  %v208_v43 = vpop.f32.mrb[3].mxu0  ;;  %v321_v47 = vmul.f32 %v451_v41, %v451_v41 }
  0xdf   :  { %279 = vst [vmem:[#allocation2 + $0x10] sm:$0xff] %v208_v43  ;;  %v295_v44 = vadd.f32 %v294_v37, %v208_v43  ;;  %v320_v45 = vmul.f32 %v208_v43, %v208_v43  ;;  %v649_v46 = vpop.f32.mrb[2].mxu1 }
  0xe0   :  { %288 = vst [vmem:[#allocation2 + $0x58] sm:$0xff] %v649_v46  ;;  %v248_v51 = vpop.f32.mrb[3].mxu1 }
  0xe1   :  { %v335_v48 = vadd.f32 %v334_v40, %v320_v45  ;;  %v454_v49 = vpop.f32.mrb[4].mxu0  ;;  %v296_v50 = vadd.f32 %v451_v41, %v295_v44  ;;  %287 = vst [vmem:[#allocation2 + $0x50] sm:$0xff] %v248_v51 }
  0xe2   :  { %282 = vst [vmem:[#allocation2 + $0x28] sm:$0xff] %v454_v49  ;;  %v218_v52 = vpop.f32.mrb[5].mxu0  ;;  %v323_v57 = vmul.f32 %v454_v49, %v454_v49 }
  0xe3   :  { %281 = vst [vmem:[#allocation2 + $0x20] sm:$0xff] %v218_v52  ;;  %v297_v53 = vadd.f32 %v296_v50, %v218_v52  ;;  %v322_v54 = vmul.f32 %v218_v52, %v218_v52  ;;  %v336_v55 = vadd.f32 %v335_v48, %v321_v47  ;;  %v466_v56 = vpop.f32.mrb[4].mxu1 }
  0xe4   :  { %290 = vst [vmem:[#allocation2 + $0x68] sm:$0xff] %v466_v56  ;;  %v258_v61 = vpop.f32.mrb[5].mxu1 }
  0xe5   :  { %v337_v58 = vadd.f32 %v336_v55, %v322_v54  ;;  %v457_v59 = vpop.f32.mrb[6].mxu0  ;;  %v298_v60 = vadd.f32 %v454_v49, %v297_v53  ;;  %289 = vst [vmem:[#allocation2 + $0x60] sm:$0xff] %v258_v61 }
  0xe6   :  { %284 = vst [vmem:[#allocation2 + $0x38] sm:$0xff] %v457_v59  ;;  %v228_v62 = vpop.f32.mrb[7].mxu0  ;;  %v325_v3 = vmul.f32 %v457_v59, %v457_v59 }
  0xe7   :  { %283 = vst [vmem:[#allocation2 + $0x30] sm:$0xff] %v228_v62  ;;  %v299_v63 = vadd.f32 %v298_v60, %v228_v62  ;;  %v324_v0 = vmul.f32 %v228_v62, %v228_v62  ;;  %v338_v1 = vadd.f32 %v337_v58, %v323_v57  ;;  %v469_v2 = vpop.f32.mrb[6].mxu1 }
  0xe8   :  { %292 = vst [vmem:[#allocation2 + $0x78] sm:$0xff] %v469_v2  ;;  %v268_v7 = vpop.f32.mrb[7].mxu1 }
  0xe9   :  { %v300_v4 = vadd.f32 %v457_v59, %v299_v63  ;;  %v339_v5 = vadd.f32 %v338_v1, %v324_v0  ;;  %291 = vst [vmem:[#allocation2 + $0x70] sm:$0xff] %v268_v7 }
  0xeb   :  { %v340_v8 = vadd.f32 %v339_v5, %v325_v3  ;;  %v301_v9 = vadd.f32 %v300_v4, %v238_v42 }
  0xec   :  { %489 = shalt.err (!%p486_p4)
}
  0xed   :  { %s490_s25 = scalar_lea.hbm %s704_s2, 2048 }
  0xee   :  { %p491_p5 = scmp.ne.s32.totalorder %s704_s2, %s490_s25  ;;  %p494_p6 = scmp.lt.u32.totalorder %s490_s25, %s704_s2 }
  0xf0   :  { %p496_p7 = pnand %p494_p6, %p491_p5 }
  0xf2   :  { %499 = shalt.err (!%p496_p7)
}
  0xf3   :  { %s550_s30 = smov 128   ;;  %s551_s5 = smov 8   ;;  %v327_v10 = vmul.f32 %v646_v39, %v646_v39  ;;  %v341_v11 = vadd.f32 %v340_v8, %v326_v6  ;;  %v302_v12 = vadd.f32 %v646_v39, %v301_v9  ;;  %v328_v13 = vmul.f32 %v248_v51, %v248_v51  ;;  %v293_v41 = vld [vmem:[#allocation4] sm:$0x1]  ;;  %v317_v44 = vld [vmem:[#allocation6] sm:$0x1] }
  0xf4   :  { %372 = dma.vmem_to_hbm [thread:$0]  %s367_s22, 2048, %s704_s2, [#allocation3], %s550_s30, %s550_s30, %s551_s5   ;;  %v329_v16 = vmul.f32 %v649_v46, %v649_v46  ;;  %v330_v19 = vmul.f32 %v258_v61, %v258_v61  ;;  %v331_v22 = vmul.f32 %v466_v56, %v466_v56  ;;  %v332_v25 = vmul.f32 %v268_v7, %v268_v7 }
  0xf5   :  { %v303_v14 = vadd.f32 %v302_v12, %v248_v51  ;;  %v342_v15 = vadd.f32 %v341_v11, %v327_v10  ;;  %v333_v28 = vmul.f32 %v469_v2, %v469_v2  ;;  %s552_s2 = smov [#allocation4]   ;;  %s553_s9 = smov [#allocation6]  }
  0xf6   :  { %s379_s8 = sshll.u32 %s552_s2, 4  ;;  %s389_s10 = sshll.u32 %s553_s9, 4  ;;  %s380_s8 = int_to_ptr.vmem [resolvable:$true] %s379_s8  ;;  %s670_s10 = int_to_ptr.vmem [resolvable:$true] %s389_s10 }
  0xf7   :  { %v343_v17 = vadd.f32 %v342_v15, %v328_v13  ;;  %v304_v18 = vadd.f32 %v649_v46, %v303_v14  ;;  %s500_s11 = scalar_lea.vmem %s380_s8, 16  ;;  %s504_s12 = scalar_lea.vmem %s380_s8, 32 }
  0xf8   :  { %p501_p8 = scmp.ne.s32.totalorder %s380_s8, %s500_s11  ;;  %p505_p9 = scmp.lt.s32.totalorder %s380_s8, %s380_s8 }
  0xf9   :  { %v305_v20 = vadd.f32 %v304_v18, %v258_v61  ;;  %v344_v21 = vadd.f32 %v343_v17, %v329_v16  ;;  %p506_p10 = scmp.lt.s32.totalorder %s504_s12, %s500_s11 }
  0xfb   :  { %v345_v23 = vadd.f32 %v344_v21, %v330_v19  ;;  %v306_v24 = vadd.f32 %v466_v56, %v305_v20  ;;  %p507_p11 = por %p506_p10, %p505_p9 }
  0xfd   :  { %v307_v26 = vadd.f32 %v306_v24, %v268_v7  ;;  %v346_v27 = vadd.f32 %v345_v23, %v331_v22  ;;  %p508_p12 = pnand %p507_p11, %p501_p8 }
  0xff   :  { %v308_v29 = vadd.f32 %v469_v2, %v307_v26  ;;  %v347_v30 = vadd.f32 %v346_v27, %v332_v25 }
 0x101   :  { %v309_v31 = vrot.slane %v308_v29, 4  ;;  %v348_v32 = vadd.f32 %v347_v30, %v333_v28 }
 0x103   :  { %v310_v33 = vadd.f32 %v309_v31, %v308_v29  ;;  %v349_v34 = vrot.slane %v348_v32, 4 }
 0x105   :  { %v311_v35 = vrot.slane %v310_v33, 2  ;;  %v350_v36 = vadd.f32 %v349_v34, %v348_v32 }
 0x107   :  { %v312_v37 = vadd.f32 %v311_v35, %v310_v33  ;;  %v351_v38 = vrot.slane %v350_v36, 2 }
 0x109   :  { %v313_v39 = vrot.slane %v312_v37, 1  ;;  %v352_v40 = vadd.f32 %v351_v38, %v350_v36 }
 0x10b   :  { %v314_v42 = vadd.f32 %v313_v39, %v312_v37  ;;  %v353_v43 = vrot.slane %v352_v40, 1 }
 0x10d   :  { %v315_v45 = vadd.f32 %v314_v42, %v293_v41  ;;  %v354_v46 = vadd.f32 %v353_v43, %v352_v40 }
 0x10f   :  { %316 = vst [vmem:[#allocation4] sm:$0x1] %v315_v45  ;;  %v355_v47 = vadd.f32 %v354_v46, %v317_v44 }
 0x110   :  { %511 = shalt.err (!%p508_p12)
}
 0x111   :  { %s512_s15 = scalar_lea.hbm %s705_s3, 16 }
 0x112   :  { %p513_p13 = scmp.ne.s32.totalorder %s705_s3, %s512_s15  ;;  %p516_p0 = scmp.lt.u32.totalorder %s512_s15, %s705_s3 }
 0x114   :  { %p518_p1 = pnand %p516_p0, %p513_p13 }
 0x116   :  { %521 = shalt.err (!%p518_p1)
}
 0x117   :  { %382 = dma.vmem_to_hbm [thread:$0]  %s380_s8, 16, %s705_s3, [#allocation5]   ;;  %356 = vst [vmem:[#allocation6] sm:$0x1] %v355_v47 }
 0x118   :  { %s522_s0 = scalar_lea.vmem %s670_s10, 16  ;;  %s526_s22 = scalar_lea.vmem %s670_s10, 32 }
 0x119   :  { %p523_p2 = scmp.ne.s32.totalorder %s670_s10, %s522_s0  ;;  %p527_p3 = scmp.lt.s32.totalorder %s670_s10, %s670_s10 }
 0x11a   :  { %p528_p4 = scmp.lt.s32.totalorder %s526_s22, %s522_s0 }
 0x11c   :  { %p529_p5 = por %p528_p4, %p527_p3 }
 0x11e   :  { %p530_p6 = pnand %p529_p5, %p523_p2 }
 0x120   :  { %533 = shalt.err (!%p530_p6)
}
 0x121   :  { %s534_s1 = scalar_lea.hbm %s706_s4, 16 }
 0x122   :  { %p535_p7 = scmp.ne.s32.totalorder %s706_s4, %s534_s1  ;;  %p538_p8 = scmp.lt.u32.totalorder %s534_s1, %s706_s4 }
 0x124   :  { %p540_p9 = pnand %p538_p8, %p535_p7 }
 0x126   :  { %543 = shalt.err (!%p540_p9)
}
 0x127   :  { %392 = dma.vmem_to_hbm [thread:$0]  %s670_s10, 16, %s706_s4, [#allocation5]  }
 0x128   :  { %544 = dma.done.wait [#allocation3], 2048  }
 0x129   :  { %545 = vsyncadd [#allocation3], 4294965248 }
 0x12a   :  { %546 = dma.done.wait [#allocation5], 32  }
 0x12b   :  { %547 = vsyncadd [#allocation5], 4294967264 }
 0x12c   :  { %402 = vsyncpa [#allocation3], 1 }
 0x12d   :  { %403 = vsyncpa [#allocation5], 1 }

</bundles_post_ra>
